<compile_context>
chip_gen: v6e
topology: v6e:2x2x1
jax: 0.10.0
libtpu: 0.0.40
codegen_flags: <defaults>
</compile_context>

<pallas_src>
import functools

import jax
import jax.numpy as jnp
from jax import lax
from jax.experimental import pallas as pl
from jax.experimental.pallas import tpu as pltpu

_LANE = 128
_SUBLANE = 8


def _round_up(x, m):
    return (x + m - 1) // m * m


def _choose_rows(n_rows, vocab, itemsize):
    """Rows per block: as large as a conservative VMEM input budget allows."""
    # Double-buffered per-row VMEM cost: the logp row itself (2 buffers) plus
    # the (rows, 1) target/mask rows, which tile-pad to 512 B each in VMEM
    # (2 arrays x 2 buffers).
    per_row = 2 * vocab * itemsize + 4 * 512
    budget = 8 * 1024 * 1024          # input-buffer budget; safe on v5e/v6e/v7x
    rows = min(budget // per_row, 8192, _round_up(n_rows, _SUBLANE))
    rows = max(_SUBLANE, (rows // _SUBLANE) * _SUBLANE)
    return int(rows)


def _lm_criterion_kernel(logp_ref, tgt_ref, mask_ref, out_ref, *,
                         rows, vocab, n_valid):
    logp = logp_ref[...]                              # (rows, vocab)
    if logp.dtype != jnp.float32:
        logp = logp.astype(jnp.float32)               # bf16 in, f32 accumulate
    tgt = tgt_ref[...]                                # (rows, 1) int32
    mask = mask_ref[...].astype(jnp.float32)          # (rows, 1)

    if n_valid % rows:                                # ragged last block (static)
        row_ids = (pl.program_id(0) * rows
                   + lax.broadcasted_iota(jnp.int32, (rows, 1), 0))
        valid = row_ids < n_valid
        tgt = jnp.where(valid, tgt, -1)               # -1 never matches a vocab id
        mask = jnp.where(valid, mask, 0.0)            # kill any NaN/garbage rows

    # Select target log-prob per row (no one-hot cast+mul), mask folded in
    # before reducing.
    vocab_ids = lax.broadcasted_iota(jnp.int32, (rows, vocab), 1)
    sel = jnp.where(vocab_ids == tgt, logp, 0.0) * mask          # (rows, vocab)

    # Rows-fold: rows/8 sublane-tiles collapse with VPU vreg adds (only a tiny
    # 8-sublane XLU tail on 8*vocab elements).
    part = jnp.sum(sel, axis=0, keepdims=True)                   # (1, vocab)

    # Lane fold to a single lane-dense (1, 128) tile using static slices (VPU).
    n_tiles, rem = divmod(vocab, _LANE)
    cols = [part[:, c * _LANE:(c + 1) * _LANE] for c in range(n_tiles)]
    if rem:
        rem_sum = jnp.sum(part[:, n_tiles * _LANE:], axis=1, keepdims=True)
        lane0 = lax.broadcasted_iota(jnp.int32, (1, _LANE), 1) == 0
        cols.append(jnp.where(lane0, rem_sum, 0.0))
    acc = cols[0]
    for col in cols[1:]:
        acc = acc + col
    out_ref[...] = acc[None]                                     # (1, 1, 128)


def language_model_criterion(logp, target, mask, *, rows=None):
    """Mean masked NLL: sum(-logp[b,t,target[b,t]] * mask[b,t]) / sum(mask)."""
    B, T, V = logp.shape
    target = target[:, :T].astype(jnp.int32)
    mask_f = mask[:, :T].astype(jnp.float32)

    n = B * T
    logp2 = logp.reshape(n, V)
    tgt2 = target.reshape(n, 1)
    mask2 = mask_f.reshape(n, 1)

    if rows is None:
        rows = _choose_rows(n, V, logp.dtype.itemsize)
    assert rows % _SUBLANE == 0 and rows >= _SUBLANE
    num_blocks = pl.cdiv(n, rows)

    kernel = functools.partial(_lm_criterion_kernel,
                               rows=rows, vocab=V, n_valid=n)

    partials = pl.pallas_call(
        kernel,
        out_shape=jax.ShapeDtypeStruct((num_blocks, 1, _LANE), jnp.float32),
        grid_spec=pltpu.PrefetchScalarGridSpec(
            num_scalar_prefetch=0,
            grid=(num_blocks,),
            in_specs=[
                pl.BlockSpec((rows, V), lambda i: (i, 0)),
                pl.BlockSpec((rows, 1), lambda i: (i, 0)),
                pl.BlockSpec((rows, 1), lambda i: (i, 0)),
            ],
            out_specs=pl.BlockSpec((1, 1, _LANE), lambda i: (i, 0, 0)),
        ),
        compiler_params=pltpu.CompilerParams(
            dimension_semantics=("parallel",),   # independent per-block partials
            vmem_limit_bytes=32 * 1024 * 1024,
        ),
    )(logp2, tgt2, mask2)

    num = jnp.sum(partials)        # tiny: num_blocks * 128 values
    den = jnp.sum(mask_f)          # denominator in plain JAX (tiny vs logp)
    return (-num / den).astype(logp.dtype)


def _reference(logp, target, mask):
    B, T, V = logp.shape
    target = target[:, :T].astype(jnp.int32)
    mask = mask[:, :T].astype(logp.dtype)
    picked = jnp.take_along_axis(logp, target[:, :, None], axis=2)[:, :, 0]
    return jnp.sum(-picked * mask) / jnp.sum(mask)


if __name__ == "__main__":
    key = jax.random.PRNGKey(0)

    # Case 1: aligned shapes (single large block, no remainder paths).
    B, T, V = 16, 16, 128
    k1, k2, k3, key = jax.random.split(key, 4)
    logits = jax.random.normal(k1, (B, T, V), dtype=jnp.float32)
    logp = jax.nn.log_softmax(logits, axis=-1)
    target = jax.random.randint(k2, (B, T), 0, V, dtype=jnp.int32)
    lengths = jax.random.randint(k3, (B,), 1, T + 1)
    mask = (jnp.arange(T)[None, :] < lengths[:, None]).astype(jnp.float32)

    loss = jax.block_until_ready(jax.jit(language_model_criterion)(logp, target, mask))
    ref = jax.block_until_ready(_reference(logp, target, mask))
    assert jnp.allclose(loss, ref, rtol=1e-5, atol=1e-5), (loss, ref)

    # Case 2: ragged shapes (partial last block + vocab not a multiple of 128).
    B2, T2, V2 = 7, 10, 160
    k1, k2, k3, key = jax.random.split(key, 4)
    logits2 = jax.random.normal(k1, (B2, T2, V2), dtype=jnp.float32)
    logp2 = jax.nn.log_softmax(logits2, axis=-1)
    target2 = jax.random.randint(k2, (B2, T2), 0, V2, dtype=jnp.int32)
    lengths2 = jax.random.randint(k3, (B2,), 1, T2 + 1)
    mask2 = (jnp.arange(T2)[None, :] < lengths2[:, None]).astype(jnp.float32)

    f2 = jax.jit(functools.partial(language_model_criterion, rows=64))
    loss2 = jax.block_until_ready(f2(logp2, target2, mask2))
    ref2 = jax.block_until_ready(_reference(logp2, target2, mask2))
    assert jnp.allclose(loss2, ref2, rtol=1e-5, atol=1e-5), (loss2, ref2)

    print("KERNEL_OK")
</pallas_src>

<mosaic_0001>
module attributes {stable_mosaic.version = 11 : i64} {
  func.func @_lm_criterion_kernel(%arg0: i32, %arg1: memref<256x128xf32, #tpu.memory_space<vmem>>, %arg2: memref<256x1xi32, #tpu.memory_space<vmem>>, %arg3: memref<256x1xf32, #tpu.memory_space<vmem>>, %arg4: memref<1x1x128xf32, #tpu.memory_space<vmem>>) attributes {dimension_semantics = [#tpu.dimension_semantics<parallel>], iteration_bounds = array<i64: 1>, scalar_prefetch = 0 : i64, scratch_operands = 0 : i64, tpu.core_type = #tpu.core_type<tc>, window_params = [{transform_indices = @transform_0, window_bounds = array<i64: 256, 128>}, {transform_indices = @transform_1, window_bounds = array<i64: 256, 1>}, {transform_indices = @transform_2, window_bounds = array<i64: 256, 1>}, {transform_indices = @transform_3, window_bounds = array<i64: 1, 1, 128>}]} {
    %c0 = arith.constant 0 : index
    %c0_0 = arith.constant 0 : index
    %0 = vector.load %arg1[%c0, %c0_0] : memref<256x128xf32, #tpu.memory_space<vmem>>, vector<256x128xf32>
    %c0_1 = arith.constant 0 : index
    %c0_2 = arith.constant 0 : index
    %1 = vector.load %arg2[%c0_1, %c0_2] : memref<256x1xi32, #tpu.memory_space<vmem>>, vector<256x1xi32>
    %c0_3 = arith.constant 0 : index
    %c0_4 = arith.constant 0 : index
    %2 = vector.load %arg3[%c0_3, %c0_4] : memref<256x1xf32, #tpu.memory_space<vmem>>, vector<256x1xf32>
    %3 = tpu.iota {dimensions = array<i32: 1>} : vector<256x128xi32>
    %4 = vector.broadcast %1 : vector<256x1xi32> to vector<256x128xi32>
    %5 = arith.cmpi eq, %3, %4 : vector<256x128xi32>
    %cst = arith.constant 0.000000e+00 : f32
    %6 = vector.broadcast %cst : f32 to vector<256x128xf32>
    %7 = arith.select %5, %0, %6 : vector<256x128xi1>, vector<256x128xf32>
    %8 = vector.broadcast %2 : vector<256x1xf32> to vector<256x128xf32>
    %9 = arith.mulf %7, %8 : vector<256x128xf32>
    %cst_5 = arith.constant dense<0.000000e+00> : vector<128xf32>
    %10 = vector.multi_reduction <add>, %9, %cst_5 [0] : vector<256x128xf32> to vector<128xf32>
    %11 = vector.shape_cast %10 : vector<128xf32> to vector<1x128xf32>
    %12 = vector.shape_cast %11 : vector<1x128xf32> to vector<1x1x128xf32>
    %c0_6 = arith.constant 0 : index
    %c0_7 = arith.constant 0 : index
    %c0_8 = arith.constant 0 : index
    %13 = vector.load %arg4[%c0_6, %c0_7, %c0_8] : memref<1x1x128xf32, #tpu.memory_space<vmem>>, vector<1x1x128xf32>
    tpu.vector_store %arg4[%c0_6, %c0_7, %c0_8], %12 {strides = array<i32>} : memref<1x1x128xf32, #tpu.memory_space<vmem>>, vector<1x1x128xf32>,
    return
  }
  func.func @transform_0(%arg0: i32) -> (i32, i32) {
    %c0_i32 = arith.constant 0 : i32
    %c0_i32_0 = arith.constant 0 : i32
    return %arg0, %c0_i32 : i32, i32
  }
  func.func @transform_1(%arg0: i32) -> (i32, i32) {
    %c0_i32 = arith.constant 0 : i32
    %c0_i32_0 = arith.constant 0 : i32
    return %arg0, %c0_i32 : i32, i32
  }
  func.func @transform_2(%arg0: i32) -> (i32, i32) {
    %c0_i32 = arith.constant 0 : i32
    %c0_i32_0 = arith.constant 0 : i32
    return %arg0, %c0_i32 : i32, i32
  }
  func.func @transform_3(%arg0: i32) -> (i32, i32, i32) {
    %c0_i32 = arith.constant 0 : i32
    %c0_i32_0 = arith.constant 0 : i32
    %c0_i32_1 = arith.constant 0 : i32
    return %arg0, %c0_i32, %c0_i32_0 : i32, i32, i32
  }
}

</mosaic_0001>

<bundles_post_ra>
// kernel: language_model_criterion.1
= control target key start
LH: loop header
LB: loop body
LE: loop exit
PB: predicated region body
PF: predicated region fallthrough
CT: control target
= control target key end

     0   :  { %v509_v0 = vmov 0   ;;  %s930_s1 = inlined_call_operand.vmem [shape: s32[256,1], index: 1, kind: input, shape index: {}]   ;;  %s931_s2 = inlined_call_operand.vmem [shape: f32[256,1], index: 2, kind: input, shape index: {}]   ;;  %s932_s0 = inlined_call_operand.vmem [shape: f32[256,128], index: 0, kind: input, shape index: {}]   ;;  %s933_s3 = inlined_call_operand.vmem [shape: f32[1,1,128], index: 3, kind: output, shape index: {}]  }
   0x1   :  { %508 = vset.pattern.permute.xlu1 %v509_v0  ;;  %507 = vset.pattern.permute.xlu0 %v509_v0  ;;  %v48_v1 = vld [vmem:[%s930_s1 + $0x10] sm:$0xff]  ;;  %v46_v2 = vld [vmem:[%s930_s1] sm:$0xff]  ;;  %v49_v3 = vld [vmem:[%s930_s1 + $0x18] sm:$0xff] }
   0x2   :  { %119 = vperm.xlu1 %508, %v48_v1   ;;  %113 = vperm.xlu0 %507, %v46_v2   ;;  %v47_v4 = vld [vmem:[%s930_s1 + $0x8] sm:$0xff]  ;;  %v50_v6 = vld [vmem:[%s930_s1 + $0x20] sm:$0xff]  ;;  %v53_v7 = vld [vmem:[%s930_s1 + $0x38] sm:$0xff] }
   0x3   :  { %v51_v5 = vld [vmem:[%s930_s1 + $0x28] sm:$0xff]  ;;  %v52_v8 = vld [vmem:[%s930_s1 + $0x30] sm:$0xff]  ;;  %v54_v10 = vld [vmem:[%s930_s1 + $0x40] sm:$0xff] }
   0x4   :  { %v55_v9 = vld [vmem:[%s930_s1 + $0x48] sm:$0xff]  ;;  %v57_v11 = vld [vmem:[%s930_s1 + $0x58] sm:$0xff]  ;;  %v56_v12 = vld [vmem:[%s930_s1 + $0x50] sm:$0xff] }
   0x5   :  { %v59_v13 = vld [vmem:[%s930_s1 + $0x68] sm:$0xff]  ;;  %v58_v14 = vld [vmem:[%s930_s1 + $0x60] sm:$0xff]  ;;  %v61_v15 = vld [vmem:[%s930_s1 + $0x78] sm:$0xff] }
   0x6   :  { %122 = vperm.xlu1 %508, %v49_v3   ;;  %116 = vperm.xlu0 %507, %v47_v4   ;;  %v60_v16 = vld [vmem:[%s930_s1 + $0x70] sm:$0xff]  ;;  %v63_v17 = vld [vmem:[%s930_s1 + $0x88] sm:$0xff]  ;;  %v62_v18 = vld [vmem:[%s930_s1 + $0x80] sm:$0xff] }
   0x7   :  { %v65_v19 = vld [vmem:[%s930_s1 + $0x98] sm:$0xff]  ;;  %v64_v20 = vld [vmem:[%s930_s1 + $0x90] sm:$0xff]  ;;  %v67_v21 = vld [vmem:[%s930_s1 + $0xa8] sm:$0xff] }
   0x8   :  { %v66_v22 = vld [vmem:[%s930_s1 + $0xa0] sm:$0xff]  ;;  %v69_v23 = vld [vmem:[%s930_s1 + $0xb8] sm:$0xff]  ;;  %v68_v24 = vld [vmem:[%s930_s1 + $0xb0] sm:$0xff] }
   0x9   :  { %v71_v25 = vld [vmem:[%s930_s1 + $0xc8] sm:$0xff]  ;;  %v70_v26 = vld [vmem:[%s930_s1 + $0xc0] sm:$0xff]  ;;  %v73_v27 = vld [vmem:[%s930_s1 + $0xd8] sm:$0xff] }
   0xa   :  { %128 = vperm.xlu1 %508, %v51_v5   ;;  %125 = vperm.xlu0 %507, %v50_v6   ;;  %v72_v28 = vld [vmem:[%s930_s1 + $0xd0] sm:$0xff]  ;;  %v75_v29 = vld [vmem:[%s930_s1 + $0xe8] sm:$0xff]  ;;  %v74_v30 = vld [vmem:[%s930_s1 + $0xe0] sm:$0xff] }
   0xb   :  { %v79_v31 = vld [vmem:[%s931_s2 + $0x8] sm:$0xff]  ;;  %v78_v32 = vld [vmem:[%s931_s2] sm:$0xff]  ;;  %v81_v33 = vld [vmem:[%s931_s2 + $0x18] sm:$0xff] }
   0xc   :  { %v80_v34 = vld [vmem:[%s931_s2 + $0x10] sm:$0xff]  ;;  %v83_v35 = vld [vmem:[%s931_s2 + $0x28] sm:$0xff]  ;;  %v82_v36 = vld [vmem:[%s931_s2 + $0x20] sm:$0xff] }
   0xd   :  { %v85_v37 = vld [vmem:[%s931_s2 + $0x38] sm:$0xff]  ;;  %v84_v38 = vld [vmem:[%s931_s2 + $0x30] sm:$0xff]  ;;  %v87_v39 = vld [vmem:[%s931_s2 + $0x48] sm:$0xff] }
   0xe   :  { %134 = vperm.xlu1 %508, %v53_v7   ;;  %131 = vperm.xlu0 %507, %v52_v8   ;;  %v86_v40 = vld [vmem:[%s931_s2 + $0x40] sm:$0xff]  ;;  %v89_v41 = vld [vmem:[%s931_s2 + $0x58] sm:$0xff]  ;;  %v88_v42 = vld [vmem:[%s931_s2 + $0x50] sm:$0xff] }
   0xf   :  { %v91_v43 = vld [vmem:[%s931_s2 + $0x68] sm:$0xff]  ;;  %v90_v44 = vld [vmem:[%s931_s2 + $0x60] sm:$0xff]  ;;  %v93_v45 = vld [vmem:[%s931_s2 + $0x78] sm:$0xff] }
  0x10   :  { %v92_v46 = vld [vmem:[%s931_s2 + $0x70] sm:$0xff]  ;;  %v95_v47 = vld [vmem:[%s931_s2 + $0x88] sm:$0xff]  ;;  %v94_v48 = vld [vmem:[%s931_s2 + $0x80] sm:$0xff] }
  0x11   :  { %v97_v49 = vld [vmem:[%s931_s2 + $0x98] sm:$0xff]  ;;  %v96_v50 = vld [vmem:[%s931_s2 + $0x90] sm:$0xff]  ;;  %v99_v51 = vld [vmem:[%s931_s2 + $0xa8] sm:$0xff] }
  0x12   :  { %140 = vperm.xlu1 %508, %v55_v9   ;;  %137 = vperm.xlu0 %507, %v54_v10   ;;  %v98_v52 = vld [vmem:[%s931_s2 + $0xa0] sm:$0xff]  ;;  %v101_v53 = vld [vmem:[%s931_s2 + $0xb8] sm:$0xff]  ;;  %v100_v54 = vld [vmem:[%s931_s2 + $0xb0] sm:$0xff] }
  0x13   :  { %v103_v55 = vld [vmem:[%s931_s2 + $0xc8] sm:$0xff]  ;;  %v102_v56 = vld [vmem:[%s931_s2 + $0xc0] sm:$0xff]  ;;  %v105_v57 = vld [vmem:[%s931_s2 + $0xd8] sm:$0xff] }
  0x14   :  { %v104_v58 = vld [vmem:[%s931_s2 + $0xd0] sm:$0xff]  ;;  %v106_v60 = vld [vmem:[%s931_s2 + $0xe0] sm:$0xff]  ;;  %v77_v61 = vld [vmem:[%s930_s1 + $0xf8] sm:$0xff] }
  0x15   :  { %v76_v59 = vld [vmem:[%s930_s1 + $0xf0] sm:$0xff]  ;;  %v107_v62 = vld [vmem:[%s931_s2 + $0xe8] sm:$0xff]  ;;  %v109_v63 = vld [vmem:[%s931_s2 + $0xf8] sm:$0xff] }
  0x16   :  { %146 = vperm.xlu1 %508, %v57_v11   ;;  %143 = vperm.xlu0 %507, %v56_v12   ;;  %v108_v0 = vld [vmem:[%s931_s2 + $0xf0] sm:$0xff] }
  0x1a   :  { %152 = vperm.xlu1 %508, %v59_v13   ;;  %149 = vperm.xlu0 %507, %v58_v14  }
  0x1e   :  { %158 = vperm.xlu1 %508, %v61_v15   ;;  %155 = vperm.xlu0 %507, %v60_v16  }
  0x22   :  { %164 = vperm.xlu1 %508, %v63_v17   ;;  %161 = vperm.xlu0 %507, %v62_v18  }
  0x26   :  { %170 = vperm.xlu1 %508, %v65_v19   ;;  %167 = vperm.xlu0 %507, %v64_v20  }
  0x2a   :  { %176 = vperm.xlu1 %508, %v67_v21   ;;  %173 = vperm.xlu0 %507, %v66_v22  }
  0x2e   :  { %182 = vperm.xlu1 %508, %v69_v23   ;;  %179 = vperm.xlu0 %507, %v68_v24  }
  0x32   :  { %188 = vperm.xlu1 %508, %v71_v25   ;;  %185 = vperm.xlu0 %507, %v70_v26  }
  0x36   :  { %194 = vperm.xlu1 %508, %v73_v27   ;;  %191 = vperm.xlu0 %507, %v72_v28   ;;  %v110_v27 = vlaneseq }
  0x3a   :  { %200 = vperm.xlu1 %508, %v75_v29   ;;  %197 = vperm.xlu0 %507, %v74_v30   ;;  %v768_v30 = vand.u32 127, %v110_v27 }
  0x3e   :  { %279 = vperm.xlu1 %508, %v79_v31   ;;  %274 = vperm.xlu0 %507, %v78_v32  }
  0x42   :  { %289 = vperm.xlu1 %508, %v81_v33   ;;  %284 = vperm.xlu0 %507, %v80_v34   ;;  %v15_v33 = vld [vmem:[%s932_s0 + $0x8] sm:$0xff]  ;;  %v14_v34 = vld [vmem:[%s932_s0] sm:$0xff] }
  0x46   :  { %299 = vperm.xlu1 %508, %v83_v35   ;;  %294 = vperm.xlu0 %507, %v82_v36  }
  0x4a   :  { %309 = vperm.xlu1 %508, %v85_v37   ;;  %304 = vperm.xlu0 %507, %v84_v38  }
  0x4e   :  { %319 = vperm.xlu1 %508, %v87_v39   ;;  %314 = vperm.xlu0 %507, %v86_v40  }
  0x52   :  { %329 = vperm.xlu1 %508, %v89_v41   ;;  %324 = vperm.xlu0 %507, %v88_v42   ;;  %v16_v41 = vld [vmem:[%s932_s0 + $0x10] sm:$0xff]  ;;  %v17_v42 = vld [vmem:[%s932_s0 + $0x18] sm:$0xff] }
  0x56   :  { %339 = vperm.xlu1 %508, %v91_v43   ;;  %334 = vperm.xlu0 %507, %v90_v44  }
  0x5a   :  { %349 = vperm.xlu1 %508, %v93_v45   ;;  %344 = vperm.xlu0 %507, %v92_v46  }
  0x5e   :  { %359 = vperm.xlu1 %508, %v95_v47   ;;  %354 = vperm.xlu0 %507, %v94_v48   ;;  %v18_v48 = vld [vmem:[%s932_s0 + $0x20] sm:$0xff] }
  0x62   :  { %369 = vperm.xlu1 %508, %v97_v49   ;;  %364 = vperm.xlu0 %507, %v96_v50  }
  0x66   :  { %379 = vperm.xlu1 %508, %v99_v51   ;;  %374 = vperm.xlu0 %507, %v98_v52   ;;  %v19_v52 = vld [vmem:[%s932_s0 + $0x28] sm:$0xff] }
  0x6a   :  { %389 = vperm.xlu1 %508, %v101_v53   ;;  %384 = vperm.xlu0 %507, %v100_v54  }
  0x6e   :  { %399 = vperm.xlu1 %508, %v103_v55   ;;  %394 = vperm.xlu0 %507, %v102_v56  }
  0x72   :  { %409 = vperm.xlu1 %508, %v105_v57   ;;  %404 = vperm.xlu0 %507, %v104_v58   ;;  %v20_v58 = vld [vmem:[%s932_s0 + $0x30] sm:$0xff] }
  0x76   :  { %203 = vperm.xlu1 %508, %v76_v59   ;;  %414 = vperm.xlu0 %507, %v106_v60  }
  0x7a   :  { %206 = vperm.xlu1 %508, %v77_v61   ;;  %419 = vperm.xlu0 %507, %v107_v62   ;;  %v21_v62 = vld [vmem:[%s932_s0 + $0x38] sm:$0xff] }
  0x7d   :  { %v120_v1 = vpop.permute.xlu1 %119  ;;  %v114_v2 = vpop.permute.xlu0 %113 }
  0x7e   :  { %429 = vperm.xlu1 %508, %v109_v63   ;;  %424 = vperm.xlu0 %507, %v108_v0   ;;  %vm208_vm0 = vcmp.eq.s32.totalorder %v768_v30, %v114_v2  ;;  %vm210_vm2 = vcmp.eq.s32.totalorder %v768_v30, %v120_v1 }
  0x7f   :  { %v240_v38 = vsel %vm208_vm0, %v14_v34, 0.0  ;;  %v242_v45 = vsel %vm210_vm2, %v16_v41, 0.0 }
  0x81   :  { %v123_v3 = vpop.permute.xlu1 %122  ;;  %v117_v4 = vpop.permute.xlu0 %116 }
  0x82   :  { %vm209_vm1 = vcmp.eq.s32.totalorder %v768_v30, %v117_v4  ;;  %vm211_vm3 = vcmp.eq.s32.totalorder %v768_v30, %v123_v3  ;;  %v22_v4 = vld [vmem:[%s932_s0 + $0x40] sm:$0xff] }
  0x83   :  { %v241_v36 = vsel %vm209_vm1, %v15_v33, 0.0  ;;  %v243_v49 = vsel %vm211_vm3, %v17_v42, 0.0 }
  0x85   :  { %v722_v5 = vpop.permute.xlu1 %128  ;;  %v126_v6 = vpop.permute.xlu0 %125 }
  0x86   :  { %vm212_vm4 = vcmp.eq.s32.totalorder %v768_v30, %v126_v6  ;;  %vm213_vm5 = vcmp.eq.s32.totalorder %v768_v30, %v722_v5 }
  0x87   :  { %v244_v55 = vsel %vm212_vm4, %v18_v48, 0.0  ;;  %v245_v59 = vsel %vm213_vm5, %v19_v52, 0.0  ;;  %v28_v52 = vld [vmem:[%s932_s0 + $0x70] sm:$0xff] }
  0x89   :  { %v724_v7 = vpop.permute.xlu1 %134  ;;  %v726_v8 = vpop.permute.xlu0 %131 }
  0x8a   :  { %vm214_vm6 = vcmp.eq.s32.totalorder %v768_v30, %v726_v8  ;;  %vm215_vm7 = vcmp.eq.s32.totalorder %v768_v30, %v724_v7  ;;  %v23_v8 = vld [vmem:[%s932_s0 + $0x48] sm:$0xff] }
  0x8b   :  { %v246_v1 = vsel %vm214_vm6, %v20_v58, 0.0  ;;  %v247_v5 = vsel %vm215_vm7, %v21_v62, 0.0 }
  0x8d   :  { %v728_v9 = vpop.permute.xlu1 %140  ;;  %v730_v10 = vpop.permute.xlu0 %137 }
  0x8e   :  { %vm216_vm8 = vcmp.eq.s32.totalorder %v768_v30, %v730_v10  ;;  %vm217_vm9 = vcmp.eq.s32.totalorder %v768_v30, %v728_v9 }
  0x8f   :  { %v248_v34 = vsel %vm216_vm8, %v22_v4, 0.0  ;;  %v32_v4 = vld [vmem:[%s932_s0 + $0x90] sm:$0xff] }
  0x91   :  { %v732_v11 = vpop.permute.xlu1 %146  ;;  %v734_v12 = vpop.permute.xlu0 %143 }
  0x92   :  { %vm218_vm10 = vcmp.eq.s32.totalorder %v768_v30, %v734_v12  ;;  %vm219_vm11 = vcmp.eq.s32.totalorder %v768_v30, %v732_v11 }
  0x95   :  { %v736_v13 = vpop.permute.xlu1 %152  ;;  %v738_v14 = vpop.permute.xlu0 %149 }
  0x96   :  { %vm220_vm12 = vcmp.eq.s32.totalorder %v768_v30, %v738_v14  ;;  %vm221_vm13 = vcmp.eq.s32.totalorder %v768_v30, %v736_v13 }
  0x99   :  { %v740_v15 = vpop.permute.xlu1 %158  ;;  %v742_v16 = vpop.permute.xlu0 %155 }
  0x9a   :  { %vm222_vm14 = vcmp.eq.s32.totalorder %v768_v30, %v742_v16  ;;  %vm223_vm15 = vcmp.eq.s32.totalorder %v768_v30, %v740_v15 }
  0x9b   :  { %v254_v58 = vsel %vm222_vm14, %v28_v52, 0.0 }
  0x9d   :  { %v744_v17 = vpop.permute.xlu1 %164  ;;  %v746_v18 = vpop.permute.xlu0 %161 }
  0x9e   :  { %vm224_vm0 = vcmp.eq.s32.totalorder %v768_v30, %v746_v18  ;;  %vm225_vm1 = vcmp.eq.s32.totalorder %v768_v30, %v744_v17 }
  0xa1   :  { %v748_v19 = vpop.permute.xlu1 %170  ;;  %v750_v20 = vpop.permute.xlu0 %167 }
  0xa2   :  { %vm226_vm2 = vcmp.eq.s32.totalorder %v768_v30, %v750_v20  ;;  %vm227_vm3 = vcmp.eq.s32.totalorder %v768_v30, %v748_v19 }
  0xa5   :  { %v752_v21 = vpop.permute.xlu1 %176  ;;  %v754_v22 = vpop.permute.xlu0 %173 }
  0xa6   :  { %vm228_vm4 = vcmp.eq.s32.totalorder %v768_v30, %v754_v22  ;;  %vm229_vm5 = vcmp.eq.s32.totalorder %v768_v30, %v752_v21 }
  0xa9   :  { %v756_v23 = vpop.permute.xlu1 %182  ;;  %v758_v24 = vpop.permute.xlu0 %179 }
  0xaa   :  { %vm230_vm6 = vcmp.eq.s32.totalorder %v768_v30, %v758_v24  ;;  %vm231_vm7 = vcmp.eq.s32.totalorder %v768_v30, %v756_v23 }
  0xad   :  { %v760_v25 = vpop.permute.xlu1 %188  ;;  %v762_v26 = vpop.permute.xlu0 %185 }
  0xae   :  { %vm232_vm8 = vcmp.eq.s32.totalorder %v768_v30, %v762_v26 }
  0xb1   :  { %v764_v28 = vpop.permute.xlu1 %194  ;;  %v766_v29 = vpop.permute.xlu0 %191 }
  0xb5   :  { %v770_v31 = vpop.permute.xlu1 %200  ;;  %v772_v32 = vpop.permute.xlu0 %197 }
  0xb9   :  { %v280_v35 = vpop.permute.xlu1 %279  ;;  %v275_v37 = vpop.permute.xlu0 %274 }
  0xba   :  { %v433_v39 = vmul.f32 %v280_v35, %v241_v36  ;;  %v432_v40 = vmul.f32 %v275_v37, %v240_v38  ;;  %v24_v36 = vld [vmem:[%s932_s0 + $0x50] sm:$0xff]  ;;  %v249_v37 = vsel %vm217_vm9, %v23_v8, 0.0  ;;  %vm233_vm9 = vcmp.eq.s32.totalorder %v768_v30, %v760_v25 }
  0xbb   :  { %v250_v42 = vsel %vm218_vm10, %v24_v36, 0.0  ;;  %vm234_vm10 = vcmp.eq.s32.totalorder %v768_v30, %v766_v29 }
  0xbc   :  { %v464_v46 = vadd.f32 %v433_v39, %v432_v40  ;;  %v25_v39 = vld [vmem:[%s932_s0 + $0x58] sm:$0xff] }
  0xbd   :  { %v290_v43 = vpop.permute.xlu1 %289  ;;  %v285_v44 = vpop.permute.xlu0 %284 }
  0xbe   :  { %v434_v47 = vmul.f32 %v285_v44, %v242_v45  ;;  %v435_v50 = vmul.f32 %v290_v43, %v243_v49  ;;  %v26_v44 = vld [vmem:[%s932_s0 + $0x60] sm:$0xff]  ;;  %v251_v45 = vsel %vm219_vm11, %v25_v39, 0.0  ;;  %vm235_vm11 = vcmp.eq.s32.totalorder %v768_v30, %v764_v28 }
  0xc0   :  { %v465_v51 = vadd.f32 %v464_v46, %v434_v47  ;;  %v27_v47 = vld [vmem:[%s932_s0 + $0x68] sm:$0xff] }
  0xc1   :  { %v300_v53 = vpop.permute.xlu1 %299  ;;  %v295_v54 = vpop.permute.xlu0 %294 }
  0xc2   :  { %v436_v56 = vmul.f32 %v295_v54, %v244_v55  ;;  %v466_v57 = vadd.f32 %v465_v51, %v435_v50  ;;  %v437_v60 = vmul.f32 %v300_v53, %v245_v59  ;;  %v252_v50 = vsel %vm220_vm12, %v26_v44, 0.0  ;;  %v29_v55 = vld [vmem:[%s932_s0 + $0x78] sm:$0xff] }
  0xc3   :  { %v253_v53 = vsel %vm221_vm13, %v27_v47, 0.0  ;;  %v38_v47 = vld [vmem:[%s932_s0 + $0xc0] sm:$0xff]  ;;  %vm236_vm12 = vcmp.eq.s32.totalorder %v768_v30, %v772_v32  ;;  %vm237_vm13 = vcmp.eq.s32.totalorder %v768_v30, %v770_v31  ;;  %v45_v31 = vld [vmem:[%s932_s0 + $0xf8] sm:$0xff] }
  0xc4   :  { %v467_v61 = vadd.f32 %v466_v57, %v436_v56  ;;  %v264_v52 = vsel %vm232_vm8, %v38_v47, 0.0 }
  0xc5   :  { %v310_v63 = vpop.permute.xlu1 %309  ;;  %v305_v0 = vpop.permute.xlu0 %304 }
  0xc6   :  { %v438_v2 = vmul.f32 %v305_v0, %v246_v1  ;;  %v468_v3 = vadd.f32 %v467_v61, %v437_v60  ;;  %v439_v6 = vmul.f32 %v310_v63, %v247_v5  ;;  %v30_v60 = vld [vmem:[%s932_s0 + $0x80] sm:$0xff]  ;;  %v255_v61 = vsel %vm223_vm15, %v29_v55, 0.0  ;;  %v31_v63 = vld [vmem:[%s932_s0 + $0x88] sm:$0xff] }
  0xc7   :  { %v257_v5 = vsel %vm225_vm1, %v31_v63, 0.0 }
  0xc8   :  { %v469_v7 = vadd.f32 %v468_v3, %v438_v2  ;;  %v256_v2 = vsel %vm224_vm0, %v30_v60, 0.0 }
  0xc9   :  { %v320_v27 = vpop.permute.xlu1 %319  ;;  %v315_v33 = vpop.permute.xlu0 %314 }
  0xca   :  { %v440_v10 = vmul.f32 %v315_v33, %v248_v34  ;;  %v470_v35 = vadd.f32 %v469_v7, %v439_v6  ;;  %v441_v9 = vmul.f32 %v320_v27, %v249_v37  ;;  %v33_v7 = vld [vmem:[%s932_s0 + $0x98] sm:$0xff]  ;;  %v258_v33 = vsel %vm226_vm2, %v32_v4, 0.0  ;;  %v35_v37 = vld [vmem:[%s932_s0 + $0xa8] sm:$0xff] }
  0xcc   :  { %v471_v38 = vadd.f32 %v470_v35, %v440_v10  ;;  %v34_v10 = vld [vmem:[%s932_s0 + $0xa0] sm:$0xff]  ;;  %v259_v35 = vsel %vm227_vm3, %v33_v7, 0.0 }
  0xcd   :  { %v330_v40 = vpop.permute.xlu1 %329  ;;  %v325_v41 = vpop.permute.xlu0 %324  ;;  %v260_v39 = vsel %vm228_vm4, %v34_v10, 0.0 }
  0xce   :  { %v442_v12 = vmul.f32 %v325_v41, %v250_v42  ;;  %v472_v43 = vadd.f32 %v471_v38, %v441_v9  ;;  %v443_v11 = vmul.f32 %v330_v40, %v251_v45  ;;  %v36_v41 = vld [vmem:[%s932_s0 + $0xb0] sm:$0xff]  ;;  %v261_v42 = vsel %vm229_vm5, %v35_v37, 0.0 }
  0xd0   :  { %v473_v46 = vadd.f32 %v472_v43, %v442_v12  ;;  %v37_v43 = vld [vmem:[%s932_s0 + $0xb8] sm:$0xff] }
  0xd1   :  { %v340_v48 = vpop.permute.xlu1 %339  ;;  %v335_v49 = vpop.permute.xlu0 %334 }
  0xd2   :  { %v444_v14 = vmul.f32 %v335_v49, %v252_v50  ;;  %v474_v51 = vadd.f32 %v473_v46, %v443_v11  ;;  %v445_v13 = vmul.f32 %v340_v48, %v253_v53  ;;  %v262_v11 = vsel %vm230_vm6, %v36_v41, 0.0  ;;  %v39_v50 = vld [vmem:[%s932_s0 + $0xc8] sm:$0xff] }
  0xd3   :  { %v263_v48 = vsel %vm231_vm7, %v37_v43, 0.0 }
  0xd4   :  { %v475_v54 = vadd.f32 %v474_v51, %v444_v14 }
  0xd5   :  { %v350_v56 = vpop.permute.xlu1 %349  ;;  %v345_v57 = vpop.permute.xlu0 %344 }
  0xd6   :  { %v446_v16 = vmul.f32 %v345_v57, %v254_v58  ;;  %v476_v59 = vadd.f32 %v475_v54, %v445_v13  ;;  %v447_v15 = vmul.f32 %v350_v56, %v255_v61  ;;  %v40_v13 = vld [vmem:[%s932_s0 + $0xd0] sm:$0xff]  ;;  %v265_v54 = vsel %vm233_vm9, %v39_v50, 0.0  ;;  %v42_v61 = vld [vmem:[%s932_s0 + $0xe0] sm:$0xff] }
  0xd7   :  { %v266_v58 = vsel %vm234_vm10, %v40_v13, 0.0 }
  0xd8   :  { %v477_v62 = vadd.f32 %v476_v59, %v446_v16  ;;  %v41_v16 = vld [vmem:[%s932_s0 + $0xd8] sm:$0xff] }
  0xd9   :  { %v360_v0 = vpop.permute.xlu1 %359  ;;  %v355_v1 = vpop.permute.xlu0 %354 }
  0xda   :  { %v448_v18 = vmul.f32 %v355_v1, %v256_v2  ;;  %v478_v3 = vadd.f32 %v477_v62, %v447_v15  ;;  %v449_v17 = vmul.f32 %v360_v0, %v257_v5  ;;  %v267_v15 = vsel %vm235_vm11, %v41_v16, 0.0  ;;  %v43_v0 = vld [vmem:[%s932_s0 + $0xe8] sm:$0xff] }
  0xdb   :  { %v268_v1 = vsel %vm236_vm12, %v42_v61, 0.0  ;;  %v269_v4 = vsel %vm237_vm13, %v43_v0, 0.0 }
  0xdc   :  { %v479_v6 = vadd.f32 %v478_v3, %v448_v18 }
  0xdd   :  { %v370_v8 = vpop.permute.xlu1 %369  ;;  %v365_v27 = vpop.permute.xlu0 %364 }
  0xde   :  { %v450_v20 = vmul.f32 %v365_v27, %v258_v33  ;;  %v480_v34 = vadd.f32 %v479_v6, %v449_v17  ;;  %v451_v19 = vmul.f32 %v370_v8, %v259_v35  ;;  %v44_v17 = vld [vmem:[%s932_s0 + $0xf0] sm:$0xff] }
  0xe0   :  { %v481_v36 = vadd.f32 %v480_v34, %v450_v20 }
  0xe1   :  { %v380_v9 = vpop.permute.xlu1 %379  ;;  %v375_v38 = vpop.permute.xlu0 %374 }
  0xe2   :  { %v452_v22 = vmul.f32 %v375_v38, %v260_v39  ;;  %v482_v40 = vadd.f32 %v481_v36, %v451_v19  ;;  %v453_v21 = vmul.f32 %v380_v9, %v261_v42 }
  0xe4   :  { %v483_v12 = vadd.f32 %v482_v40, %v452_v22 }
  0xe5   :  { %v390_v44 = vpop.permute.xlu1 %389  ;;  %v385_v45 = vpop.permute.xlu0 %384 }
  0xe6   :  { %v454_v24 = vmul.f32 %v385_v45, %v262_v11  ;;  %v484_v46 = vadd.f32 %v483_v12, %v453_v21  ;;  %v455_v23 = vmul.f32 %v390_v44, %v263_v48 }
  0xe8   :  { %v485_v49 = vadd.f32 %v484_v46, %v454_v24 }
  0xe9   :  { %v400_v14 = vpop.permute.xlu1 %399  ;;  %v395_v51 = vpop.permute.xlu0 %394 }
  0xea   :  { %v456_v26 = vmul.f32 %v395_v51, %v264_v52  ;;  %v486_v53 = vadd.f32 %v485_v49, %v455_v23  ;;  %v457_v25 = vmul.f32 %v400_v14, %v265_v54 }
  0xec   :  { %v487_v55 = vadd.f32 %v486_v53, %v456_v26 }
  0xed   :  { %v410_v56 = vpop.permute.xlu1 %409  ;;  %v405_v57 = vpop.permute.xlu0 %404 }
  0xee   :  { %v458_v29 = vmul.f32 %v405_v57, %v266_v58  ;;  %v488_v59 = vadd.f32 %v487_v55, %v457_v25  ;;  %v459_v28 = vmul.f32 %v410_v56, %v267_v15 }
  0xf0   :  { %v489_v60 = vadd.f32 %v488_v59, %v458_v29 }
  0xf1   :  { %v204_v62 = vpop.permute.xlu1 %203  ;;  %v415_v63 = vpop.permute.xlu0 %414 }
  0xf2   :  { %v460_v2 = vmul.f32 %v415_v63, %v268_v1  ;;  %v490_v18 = vadd.f32 %v489_v60, %v459_v28  ;;  %vm238_vm14 = vcmp.eq.s32.totalorder %v768_v30, %v204_v62 }
  0xf3   :  { %v270_v27 = vsel %vm238_vm14, %v44_v17, 0.0 }
  0xf4   :  { %v491_v6 = vadd.f32 %v490_v18, %v460_v2 }
  0xf5   :  { %v207_v32 = vpop.permute.xlu1 %206  ;;  %v420_v3 = vpop.permute.xlu0 %419 }
  0xf6   :  { %v461_v5 = vmul.f32 %v420_v3, %v269_v4  ;;  %vm239_vm15 = vcmp.eq.s32.totalorder %v768_v30, %v207_v32 }
  0xf7   :  { %v271_v34 = vsel %vm239_vm15, %v45_v31, 0.0 }
  0xf8   :  { %v492_v33 = vadd.f32 %v491_v6, %v461_v5 }
  0xf9   :  { %v430_v7 = vpop.permute.xlu1 %429  ;;  %v425_v8 = vpop.permute.xlu0 %424 }
  0xfa   :  { %v462_v20 = vmul.f32 %v425_v8, %v270_v27  ;;  %v463_v10 = vmul.f32 %v430_v7, %v271_v34 }
  0xfc   :  { %v493_v35 = vadd.f32 %v492_v33, %v462_v20 }
  0xfe   :  { %v494_v19 = vadd.f32 %v493_v35, %v463_v10 }
 0x100   :  { %v495_v36 = vrot.slane %v494_v19, 4 }
 0x102   :  { %v496_v37 = vadd.f32 %v495_v36, %v494_v19 }
 0x104   :  { %v497_v9 = vrot.slane %v496_v37, 2 }
 0x106   :  { %v498_v38 = vadd.f32 %v497_v9, %v496_v37 }
 0x108   :  { %v499_v39 = vrot.slane %v498_v38, 1 }
 0x10a   :  { %v500_v22 = vadd.f32 %v499_v39, %v498_v38 }
 0x10c   :  { %501 = vst [vmem:[%s933_s3] sm:$0x1] %v500_v22 }

</bundles_post_ra>
